<compile_context>
chip_gen: v6e
topology: v6e:2x2x1
jax: 0.10.0
libtpu: 0.0.40
codegen_flags: <defaults>
</compile_context>

<pallas_src>
import jax
import jax.numpy as jnp
from jax.experimental import pallas as pl
from jax.experimental.pallas import tpu as pltpu


_SQRT_2_OVER_PI = 0.7978845608028654
_VMEM_LIMIT_BYTES = 48 * 1024 * 1024          # safe on v7x (64 MiB physical)
_RESIDENT_WEIGHT_BUDGET = 36 * 1024 * 1024    # weights + working set headroom


def _gelu_tanh(x):
    # Matches torch.nn.GELU(approximate='tanh'); evaluated in f32.
    return 0.5 * x * (1.0 + jnp.tanh(_SQRT_2_OVER_PI * (x + 0.044715 * x * x * x)))


def _mlp_resident_kernel(x_ref, w1_ref, b1_ref, w2_ref, b2_ref, out_ref):
    # Weights are VMEM-resident (constant index maps); grid only over M tiles.
    # x_ref: (TM, D) bf16; w1_ref: (D, H) bf16; b1_ref: (1, H)
    # w2_ref: (H, DOUT) bf16; b2_ref: (1, DOUT); out_ref: (TM, DOUT)
    h = jnp.dot(x_ref[...], w1_ref[...], preferred_element_type=jnp.float32)
    h = h + b1_ref[...].astype(jnp.float32)
    g = _gelu_tanh(h).astype(w2_ref.dtype)
    # TODO(synk): nn.Dropout with p > 0 in training mode would need
    # pltpu.prng_seed / pltpu.stateful_bernoulli here; with the reference
    # defaults (p = 0 / eval) dropout is identity, as is norm (Identity).
    y = jnp.dot(g, w2_ref[...], preferred_element_type=jnp.float32)
    out_ref[...] = (y + b2_ref[...].astype(jnp.float32)).astype(out_ref.dtype)


def _mlp_tiled_kernel(x_ref, w1_ref, b1_ref, w2_ref, b2_ref, out_ref, acc_ref):
    # Fallback when the full weights do not fit VMEM: hidden axis is the fc2
    # contraction, accumulated in an f32 VMEM scratch resident across k.
    k = pl.program_id(1)

    h = jnp.dot(x_ref[...], w1_ref[...], preferred_element_type=jnp.float32)
    h = h + b1_ref[...].astype(jnp.float32)
    g = _gelu_tanh(h).astype(w2_ref.dtype)
    partial = jnp.dot(g, w2_ref[...], preferred_element_type=jnp.float32)

    @pl.when(k == 0)
    def _():
        acc_ref[...] = partial          # direct write: no zero-init + RMW

    @pl.when(k > 0)
    def _():
        acc_ref[...] += partial

    @pl.when(k == pl.num_programs(1) - 1)
    def _():
        out_ref[...] = (acc_ref[...] + b2_ref[...].astype(jnp.float32)
                        ).astype(out_ref.dtype)


def mlp_forward(x, w1, b1, w2, b2, *, block_m=256, block_h=512):
    """Fused MLP forward: gelu_tanh(x @ w1 + b1) @ w2 + b2.

    x: (..., D); w1: (D, H); b1: (H,); w2: (H, DOUT); b2: (DOUT,).
    w1/w2 are cast to bf16 (MXU-native); accumulation stays f32.
    """
    *lead, d = x.shape
    m = 1
    for s in lead:
        m *= s

    d_w, h = w1.shape
    h_w, dout = w2.shape
    assert d_w == d and h_w == h, "weight shapes inconsistent with input"

    out_dtype = x.dtype
    x2 = x.reshape(m, d).astype(jnp.bfloat16)
    w1_bf = w1.astype(jnp.bfloat16)
    w2_bf = w2.astype(jnp.bfloat16)
    b1_2d = b1.reshape(1, h)
    b2_2d = b2.reshape(1, dout)

    tm = min(block_m, m)
    assert m % tm == 0, "batch*seq must tile evenly for this demo"

    cost = pl.CostEstimate(
        flops=2 * m * (d * h + h * dout),
        transcendentals=m * h,
        bytes_accessed=(x2.size * 2 + w1_bf.size * 2 + w2_bf.size * 2
                        + b1.size * 4 + b2.size * 4
                        + m * dout * jnp.dtype(out_dtype).itemsize),
    )

    weight_bytes = 2 * (d * h + h * dout + h + dout)
    # per-M-tile working set (x, h/g, acc/out, all generously counted as f32,
    # double buffered) -- conservative so the resident path never VMEM-OOMs.
    tile_bytes = 4 * tm * (d + 2 * h + 2 * dout) * 4
    use_resident = (weight_bytes + tile_bytes) <= _RESIDENT_WEIGHT_BUDGET

    if use_resident:
        out = pl.pallas_call(
            _mlp_resident_kernel,
            out_shape=jax.ShapeDtypeStruct((m, dout), out_dtype),
            grid=(m // tm,),
            in_specs=[
                pl.BlockSpec((tm, d), lambda i: (i, 0)),     # x tile
                pl.BlockSpec((d, h), lambda i: (0, 0)),      # W1 (resident)
                pl.BlockSpec((1, h), lambda i: (0, 0)),      # b1
                pl.BlockSpec((h, dout), lambda i: (0, 0)),   # W2 (resident)
                pl.BlockSpec((1, dout), lambda i: (0, 0)),   # b2
            ],
            out_specs=pl.BlockSpec((tm, dout), lambda i: (i, 0)),
            compiler_params=pltpu.CompilerParams(
                dimension_semantics=("parallel",),
                vmem_limit_bytes=_VMEM_LIMIT_BYTES),
            cost_estimate=cost,
        )(x2, w1_bf, b1_2d, w2_bf, b2_2d)
    else:
        th = min(block_h, h)
        assert h % th == 0, "hidden size must tile evenly for this demo"
        grid = (m // tm, h // th)   # (parallel token tiles, fc2-reduction tiles)
        out = pl.pallas_call(
            _mlp_tiled_kernel,
            out_shape=jax.ShapeDtypeStruct((m, dout), out_dtype),
            grid=grid,
            in_specs=[
                pl.BlockSpec((tm, d), lambda i, k: (i, 0)),      # x tile
                pl.BlockSpec((d, th), lambda i, k: (0, k)),      # W1 hidden tile
                pl.BlockSpec((1, th), lambda i, k: (0, k)),      # b1 hidden tile
                pl.BlockSpec((th, dout), lambda i, k: (k, 0)),   # W2 hidden tile
                pl.BlockSpec((1, dout), lambda i, k: (0, 0)),    # b2
            ],
            out_specs=pl.BlockSpec((tm, dout), lambda i, k: (i, 0)),
            scratch_shapes=[pltpu.VMEM((tm, dout), jnp.float32)],
            compiler_params=pltpu.CompilerParams(
                dimension_semantics=("parallel", "arbitrary"),
                vmem_limit_bytes=_VMEM_LIMIT_BYTES),
            cost_estimate=cost,
        )(x2, w1_bf, b1_2d, w2_bf, b2_2d)

    return out.reshape(*lead, dout)


def mlp_ref(x, w1, b1, w2, b2):
    """Pure-JAX reference (same bf16 operand rounding as the kernel)."""
    xb = x.astype(jnp.bfloat16).astype(jnp.float32)
    w1b = w1.astype(jnp.bfloat16).astype(jnp.float32)
    w2b = w2.astype(jnp.bfloat16).astype(jnp.float32)
    h = xb @ w1b + b1.astype(jnp.float32)
    g = 0.5 * h * (1.0 + jnp.tanh(_SQRT_2_OVER_PI * (h + 0.044715 * h ** 3)))
    g = g.astype(jnp.bfloat16).astype(jnp.float32)
    return g @ w2b + b2.astype(jnp.float32)


class MlpPallas:
    """JAX/Pallas port of the PyTorch Mlp forward pass (inference path)."""

    def __init__(self, in_features, hidden_features=None, out_features=None,
                 drop=0.0, key=None, dtype=jnp.float32):
        out_features = out_features or in_features
        hidden_features = hidden_features or in_features
        k1, k2, k3, k4 = jax.random.split(key, 4)
        # Deterministic synthetic init (values need not match torch's RNG).
        self.w1 = (0.02 * jax.random.normal(k1, (in_features, hidden_features))).astype(dtype)
        self.b1 = (0.01 * jax.random.normal(k2, (hidden_features,))).astype(dtype)
        self.w2 = (0.02 * jax.random.normal(k3, (hidden_features, out_features))).astype(dtype)
        self.b2 = (0.01 * jax.random.normal(k4, (out_features,))).astype(dtype)
        self.drop = drop  # inference path: identity

    def __call__(self, x):
        return mlp_forward(x, self.w1, self.b1, self.w2, self.b2)


if __name__ == "__main__":
    # Small but TPU-friendly (128-aligned lane dims) shapes.
    batch, seq = 2, 8
    in_features, hidden_features, out_features = 128, 256, 128

    root = jax.random.PRNGKey(0)
    k_mod, k_x = jax.random.split(root)

    mlp = MlpPallas(in_features, hidden_features, out_features, key=k_mod)
    x = jax.random.normal(k_x, (batch, seq, in_features), dtype=jnp.float32)

    out = jax.block_until_ready(mlp(x))
    assert out.shape == (batch, seq, out_features)

    ref = mlp_ref(x.reshape(-1, in_features), mlp.w1, mlp.b1, mlp.w2, mlp.b2)
    ref = ref.reshape(batch, seq, out_features)
    max_err = float(jnp.max(jnp.abs(out.astype(jnp.float32) - ref)))
    # bf16 MXU datapath: tolerance loosened vs the pure-f32 check.
    assert jnp.allclose(out.astype(jnp.float32), ref, atol=1e-2, rtol=1e-2), (
        f"mismatch vs reference: {max_err}")

    print("KERNEL_OK")
</pallas_src>

<mosaic_0001>
module attributes {stable_mosaic.version = 11 : i64} {
  func.func @_mlp_resident_kernel(%arg0: i32, %arg1: memref<16x128xbf16, #tpu.memory_space<vmem>>, %arg2: memref<128x256xbf16, #tpu.memory_space<vmem>>, %arg3: memref<1x256xf32, #tpu.memory_space<vmem>>, %arg4: memref<256x128xbf16, #tpu.memory_space<vmem>>, %arg5: memref<1x128xf32, #tpu.memory_space<vmem>>, %arg6: memref<16x128xf32, #tpu.memory_space<vmem>>) attributes {dimension_semantics = [#tpu.dimension_semantics<parallel>], iteration_bounds = array<i64: 1>, scalar_prefetch = 0 : i64, scratch_operands = 0 : i64, tpu.core_type = #tpu.core_type<tc>, window_params = [{transform_indices = @transform_0, window_bounds = array<i64: 16, 128>}, {pipeline_mode = #tpu.pipeline_mode<synchronous>, transform_indices = @transform_1, window_bounds = array<i64: 128, 256>}, {pipeline_mode = #tpu.pipeline_mode<synchronous>, transform_indices = @transform_2, window_bounds = array<i64: 1, 256>}, {pipeline_mode = #tpu.pipeline_mode<synchronous>, transform_indices = @transform_3, window_bounds = array<i64: 256, 128>}, {pipeline_mode = #tpu.pipeline_mode<synchronous>, transform_indices = @transform_4, window_bounds = array<i64: 1, 128>}, {transform_indices = @transform_5, window_bounds = array<i64: 16, 128>}]} {
    %c0 = arith.constant 0 : index
    %c0_0 = arith.constant 0 : index
    %0 = vector.load %arg1[%c0, %c0_0] : memref<16x128xbf16, #tpu.memory_space<vmem>>, vector<16x128xbf16>
    %c0_1 = arith.constant 0 : index
    %c0_2 = arith.constant 0 : index
    %1 = vector.load %arg2[%c0_1, %c0_2] : memref<128x256xbf16, #tpu.memory_space<vmem>>, vector<128x256xbf16>
    %cst = arith.constant dense<0.000000e+00> : vector<16x256xf32>
    %2 = tpu.matmul %0, %1, %cst {dimension_numbers = #tpu.dot_dimension_numbers<[1], [0], [0], [1], [0, 0, 1, 1], [], []>} : vector<16x128xbf16>, vector<128x256xbf16>, vector<16x256xf32> -> vector<16x256xf32>
    %c0_3 = arith.constant 0 : index
    %c0_4 = arith.constant 0 : index
    %3 = vector.load %arg3[%c0_3, %c0_4] : memref<1x256xf32, #tpu.memory_space<vmem>>, vector<1x256xf32>
    %4 = vector.broadcast %3 : vector<1x256xf32> to vector<16x256xf32>
    %5 = arith.addf %2, %4 : vector<16x256xf32>
    %cst_5 = arith.constant 5.000000e-01 : f32
    %6 = vector.broadcast %cst_5 : f32 to vector<16x256xf32>
    %7 = arith.mulf %6, %5 : vector<16x256xf32>
    %cst_6 = arith.constant 4.471500e-02 : f32
    %8 = vector.broadcast %cst_6 : f32 to vector<16x256xf32>
    %9 = arith.mulf %8, %5 : vector<16x256xf32>
    %10 = arith.mulf %9, %5 : vector<16x256xf32>
    %11 = arith.mulf %10, %5 : vector<16x256xf32>
    %12 = arith.addf %5, %11 : vector<16x256xf32>
    %cst_7 = arith.constant 0.797884583 : f32
    %13 = vector.broadcast %cst_7 : f32 to vector<16x256xf32>
    %14 = arith.mulf %13, %12 : vector<16x256xf32>
    %15 = math.tanh %14 : vector<16x256xf32>
    %cst_8 = arith.constant 1.000000e+00 : f32
    %16 = vector.broadcast %cst_8 : f32 to vector<16x256xf32>
    %17 = arith.addf %16, %15 : vector<16x256xf32>
    %18 = arith.mulf %7, %17 : vector<16x256xf32>
    %19 = arith.truncf %18 : vector<16x256xf32> to vector<16x256xbf16>
    %c0_9 = arith.constant 0 : index
    %c0_10 = arith.constant 0 : index
    %20 = vector.load %arg4[%c0_9, %c0_10] : memref<256x128xbf16, #tpu.memory_space<vmem>>, vector<256x128xbf16>
    %cst_11 = arith.constant dense<0.000000e+00> : vector<16x128xf32>
    %21 = tpu.matmul %19, %20, %cst_11 {dimension_numbers = #tpu.dot_dimension_numbers<[1], [0], [0], [1], [0, 0, 1, 1], [], []>} : vector<16x256xbf16>, vector<256x128xbf16>, vector<16x128xf32> -> vector<16x128xf32>
    %c0_12 = arith.constant 0 : index
    %c0_13 = arith.constant 0 : index
    %22 = vector.load %arg5[%c0_12, %c0_13] : memref<1x128xf32, #tpu.memory_space<vmem>>, vector<1x128xf32>
    %23 = vector.broadcast %22 : vector<1x128xf32> to vector<16x128xf32>
    %24 = arith.addf %21, %23 : vector<16x128xf32>
    %c0_14 = arith.constant 0 : index
    %c0_15 = arith.constant 0 : index
    %25 = vector.load %arg6[%c0_14, %c0_15] : memref<16x128xf32, #tpu.memory_space<vmem>>, vector<16x128xf32>
    tpu.vector_store %arg6[%c0_14, %c0_15], %24 {strides = array<i32>} : memref<16x128xf32, #tpu.memory_space<vmem>>, vector<16x128xf32>,
    return
  }
  func.func @transform_0(%arg0: i32) -> (i32, i32) {
    %c0_i32 = arith.constant 0 : i32
    %c0_i32_0 = arith.constant 0 : i32
    return %arg0, %c0_i32 : i32, i32
  }
  func.func @transform_1(%arg0: i32) -> (i32, i32) {
    %c0_i32 = arith.constant 0 : i32
    %c0_i32_0 = arith.constant 0 : i32
    %c0_i32_1 = arith.constant 0 : i32
    return %c0_i32, %c0_i32_0 : i32, i32
  }
  func.func @transform_2(%arg0: i32) -> (i32, i32) {
    %c0_i32 = arith.constant 0 : i32
    %c0_i32_0 = arith.constant 0 : i32
    %c0_i32_1 = arith.constant 0 : i32
    return %c0_i32, %c0_i32_0 : i32, i32
  }
  func.func @transform_3(%arg0: i32) -> (i32, i32) {
    %c0_i32 = arith.constant 0 : i32
    %c0_i32_0 = arith.constant 0 : i32
    %c0_i32_1 = arith.constant 0 : i32
    return %c0_i32, %c0_i32_0 : i32, i32
  }
  func.func @transform_4(%arg0: i32) -> (i32, i32) {
    %c0_i32 = arith.constant 0 : i32
    %c0_i32_0 = arith.constant 0 : i32
    %c0_i32_1 = arith.constant 0 : i32
    return %c0_i32, %c0_i32_0 : i32, i32
  }
  func.func @transform_5(%arg0: i32) -> (i32, i32) {
    %c0_i32 = arith.constant 0 : i32
    %c0_i32_0 = arith.constant 0 : i32
    return %arg0, %c0_i32 : i32, i32
  }
}

</mosaic_0001>

<bundles_post_ra>
// kernel: tpu_custom_call.1
= control target key start
LH: loop header
LB: loop body
LE: loop exit
PB: predicated region body
PF: predicated region fallthrough
CT: control target
= control target key end

     0   :  { %10 = vsyncpa [#allocation3], 0  ;;  %s719_s0 = inlined_call_operand.hbm [shape: bf16[16,128], index: 0, kind: input, shape index: {}]   ;;  %s720_s1 = inlined_call_operand.hbm [shape: bf16[128,256], index: 1, kind: input, shape index: {}]   ;;  %s721_s2 = inlined_call_operand.vmem [shape: f32[1,256], index: 2, kind: input, shape index: {}]   ;;  %s722_s3 = inlined_call_operand.hbm [shape: bf16[256,128], index: 3, kind: input, shape index: {}]   ;;  %s723_s4 = inlined_call_operand.vmem [shape: f32[1,128], index: 4, kind: input, shape index: {}]   ;;  %s724_s5 = inlined_call_operand.hbm [shape: f32[16,128], index: 5, kind: output, shape index: {}]  }
   0x1   :  { %11 = vsyncpa [#allocation6], 0 }
   0x2   :  { %12 = vsyncpa [#allocation4], 0  ;;  %s656_s18 = smov [#allocation5]  }
   0x3   :  { %s30_s19 = sshll.u32 %s656_s18, 4  ;;  %s31_s19 = int_to_ptr.vmem [resolvable:$true] %s30_s19 }
   0x4   :  { %s578_s20 = scalar_lea.vmem %s31_s19, 2048  ;;  %p583_p1 = scmp.lt.s32.totalorder %s31_s19, %s31_s19 }
   0x5   :  { %p579_p0 = scmp.ne.s32.totalorder %s31_s19, %s578_s20  ;;  %p584_p2 = scmp.lt.s32.totalorder %s578_s20, %s578_s20 }
   0x7   :  { %p585_p3 = por %p584_p2, %p583_p1 }
   0x9   :  { %p586_p4 = pnand %p585_p3, %p579_p0 }
   0xb   :  { %589 = shalt.err (!%p586_p4)
}
   0xc   :  { %s657_s21 = smov 128   ;;  %s658_s22 = smov 8  }
   0xd   :  { %36 = dma.hbm_to_vmem [thread:$0]  %s720_s1, 2048, %s31_s19, [#allocation6], %s657_s21, %s657_s21, %s658_s22  }
   0xe   :  { %s659_s25 = smov [#allocation2]  }
   0xf   :  { %s18_s26 = sshll.u32 %s659_s25, 4  ;;  %s19_s26 = int_to_ptr.vmem [resolvable:$true] %s18_s26 }
  0x10   :  { %s598_s27 = scalar_lea.vmem %s19_s26, 128  ;;  %p603_p6 = scmp.lt.s32.totalorder %s19_s26, %s19_s26 }
  0x11   :  { %p599_p5 = scmp.ne.s32.totalorder %s19_s26, %s598_s27  ;;  %p604_p7 = scmp.lt.s32.totalorder %s598_s27, %s598_s27 }
  0x13   :  { %p605_p8 = por %p604_p7, %p603_p6 }
  0x15   :  { %p606_p9 = pnand %p605_p8, %p599_p5 }
  0x17   :  { %609 = shalt.err (!%p606_p9)
}
  0x18   :  { %s660_s28 = smov 64   ;;  %s661_s29 = smov 4  }
  0x19   :  { %24 = dma.hbm_to_vmem [thread:$0]  %s719_s0, 128, %s19_s26, [#allocation3], %s660_s28, %s660_s28, %s661_s29  }
  0x1a   :  { %s662_s7 = smov [#allocation7]  }
  0x1b   :  { %s44_s8 = sshll.u32 %s662_s7, 4  ;;  %s45_s8 = int_to_ptr.vmem [resolvable:$true] %s44_s8 }
  0x1c   :  { %s618_s1 = scalar_lea.vmem %s45_s8, 2048  ;;  %p623_p11 = scmp.lt.s32.totalorder %s45_s8, %s45_s8 }
  0x1d   :  { %p619_p10 = scmp.ne.s32.totalorder %s45_s8, %s618_s1  ;;  %p624_p12 = scmp.lt.s32.totalorder %s618_s1, %s618_s1 }
  0x1f   :  { %p625_p13 = por %p624_p12, %p623_p11 }
  0x21   :  { %p626_p0 = pnand %p625_p13, %p619_p10 }
  0x23   :  { %629 = shalt.err (!%p626_p0)
}
  0x24   :  { %50 = dma.hbm_to_vmem [thread:$0]  %s722_s3, 2048, %s45_s8, [#allocation6], %s660_s28, %s660_s28, %s661_s29  }
  0x25   :  { %650 = dma.done.wait [#allocation3], 128  }
  0x26   :  { %651 = vsyncadd [#allocation3], 4294967168 }
  0x27   :  { %652 = dma.done.wait [#allocation6], 4096  }
  0x28   :  { %653 = vsyncadd [#allocation6], 4294963200  ;;  %v663_v0 = vmov 0   ;;  %v521_v1 = vld [vmem:[#allocation5 + $0x74] ss:$8 sps:$4 sm:$0xff]   ;;  %v550_v22 = vld [vmem:[#allocation7 + $0x68] sm:$0xff]   ;;  %v83_v34 = vlaneseq }
  0x29   :  { %211 = vmatprep.mubr.bf16.mxu0 %v663_v0  ;;  %v523_v2 = vld [vmem:[#allocation5 + $0x70] ss:$8 sps:$4 sm:$0xff]   ;;  %179 = vmatprep.subr.bf16.mxu0 %v521_v1  ;;  %v524_v3 = vld [vmem:[#allocation5 + $0x64] ss:$8 sps:$4 sm:$0xff]   ;;  %v526_v4 = vld [vmem:[#allocation5 + $0x60] ss:$8 sps:$4 sm:$0xff]  }
  0x2a   :  { %180 = vmatpush1.bf16.msra.mxu0 %v523_v2  ;;  %v527_v5 = vld [vmem:[#allocation5 + $0x54] ss:$8 sps:$4 sm:$0xff]   ;;  %v529_v6 = vld [vmem:[#allocation5 + $0x50] ss:$8 sps:$4 sm:$0xff]   ;;  %v530_v7 = vld [vmem:[#allocation5 + $0x44] ss:$8 sps:$4 sm:$0xff]  }
  0x2b   :  { %181 = vmatprep.subr.bf16.mxu0 %v524_v3  ;;  %v532_v8 = vld [vmem:[#allocation5 + $0x40] ss:$8 sps:$4 sm:$0xff]   ;;  %v533_v9 = vld [vmem:[#allocation5 + $0x34] ss:$8 sps:$4 sm:$0xff]   ;;  %v535_v10 = vld [vmem:[#allocation5 + $0x30] ss:$8 sps:$4 sm:$0xff]  }
  0x2c   :  { %v536_v11 = vld [vmem:[#allocation5 + $0x24] ss:$8 sps:$4 sm:$0xff]   ;;  %v538_v12 = vld [vmem:[#allocation5 + $0x20] ss:$8 sps:$4 sm:$0xff]   ;;  %v539_v13 = vld [vmem:[#allocation5 + $0x14] ss:$8 sps:$4 sm:$0xff]  }
  0x2d   :  { %v541_v14 = vld [vmem:[#allocation5 + $0x10] ss:$8 sps:$4 sm:$0xff]   ;;  %v542_v15 = vld [vmem:[#allocation5 + $0x4] ss:$8 sps:$4 sm:$0xff]   ;;  %v544_v16 = vld [vmem:[#allocation5] ss:$8 sps:$4 sm:$0xff]  }
  0x2e   :  { %182 = vmatpush1.bf16.msra.mxu0 %v526_v4  ;;  %v545_v17 = vld [vmem:[#allocation2] sm:$0xff]   ;;  %v548_v20 = vld [vmem:[#allocation7 + $0x70] sm:$0xff]   ;;  %v551_v23 = vld [vmem:[#allocation7 + $0x28] sm:$0xff]   ;;  %v84_v35 = vshrl.u32 %v83_v34, 7  ;;  %s664_s12 = smov [#allocation8]  }
  0x2f   :  { %183 = vmatprep.subr.bf16.mxu0 %v527_v5  ;;  %v546_v18 = vld [vmem:[#allocation7 + $0x78] sm:$0xff]   ;;  %v549_v21 = vld [vmem:[#allocation7 + $0x30] sm:$0xff]   ;;  %v552_v24 = vld [vmem:[#allocation7 + $0x60] sm:$0xff]   ;;  %s443_s13 = sshll.u32 %s664_s12, 4  ;;  %s444_s13 = int_to_ptr.vmem [resolvable:$true] %s443_s13 }
  0x30   :  { %v547_v19 = vld [vmem:[#allocation7 + $0x38] sm:$0xff]   ;;  %490 = vmatprep.subr.bf16.mxu1 %v546_v18  ;;  %v553_v25 = vld [vmem:[#allocation7 + $0x20] sm:$0xff]   ;;  %v556_v28 = vld [vmem:[#allocation7 + $0x50] sm:$0xff]   ;;  %v85_v36 = vsub.s32 0, %v84_v35  ;;  %v89_v38 = vsub.s32 1, %v84_v35  ;;  %s630_s14 = scalar_lea.vmem %s444_s13, 256  ;;  %p635_p2 = scmp.lt.s32.totalorder %s444_s13, %s444_s13 }
  0x31   :  { %491 = vmatpush3.bf16.msra.mxu1 %v547_v19  ;;  %v554_v26 = vld [vmem:[#allocation7 + $0x58] sm:$0xff]   ;;  %v557_v29 = vld [vmem:[#allocation7 + $0x10] sm:$0xff]   ;;  %v558_v30 = vld [vmem:[#allocation7 + $0x48] sm:$0xff]   ;;  %p631_p1 = scmp.ne.s32.totalorder %s444_s13, %s630_s14  ;;  %p636_p3 = scmp.lt.s32.totalorder %s630_s14, %s630_s14 }
  0x32   :  { %184 = vmatpush1.bf16.msra.mxu0 %v529_v6  ;;  %492 = vmatprep.subr.bf16.mxu1 %v548_v20  ;;  %v555_v27 = vld [vmem:[#allocation7 + $0x18] sm:$0xff]   ;;  %v559_v31 = vld [vmem:[#allocation7 + $0x8] sm:$0xff]   ;;  %v560_v32 = vld [vmem:[#allocation7 + $0x40] sm:$0xff]  }
  0x33   :  { %185 = vmatprep.subr.bf16.mxu0 %v530_v7  ;;  %v561_v33 = vld [vmem:[#allocation7] sm:$0xff]   ;;  %v81_v37 = vld [vmem:[%s721_s2] sm:$0x3]  ;;  %p637_p4 = por %p636_p3, %p635_p2 }
  0x34   :  { %v86_v39 = vrot.slane %v81_v37, %v85_v36  ;;  %v90_v40 = vrot.slane %v81_v37, %v89_v38 }
  0x35   :  { %493 = vmatpush3.bf16.msra.mxu1 %v549_v21  ;;  %p638_p5 = pnand %p637_p4, %p631_p1 }
  0x36   :  { %186 = vmatpush1.bf16.msra.mxu0 %v532_v8  ;;  %494 = vmatprep.subr.bf16.mxu1 %v550_v22 }
  0x37   :  { %187 = vmatprep.subr.bf16.mxu0 %v533_v9 }
  0x39   :  { %495 = vmatpush3.bf16.msra.mxu1 %v551_v23 }
  0x3a   :  { %188 = vmatpush1.bf16.msra.mxu0 %v535_v10  ;;  %496 = vmatprep.subr.bf16.mxu1 %v552_v24  ;;  %v473_v24 = vld [vmem:[%s723_s4] ss:$0 sm:$0xff] }
  0x3b   :  { %189 = vmatprep.subr.bf16.mxu0 %v536_v11 }
  0x3d   :  { %497 = vmatpush3.bf16.msra.mxu1 %v553_v25 }
  0x3e   :  { %190 = vmatpush1.bf16.msra.mxu0 %v538_v12  ;;  %498 = vmatprep.subr.bf16.mxu1 %v554_v26 }
  0x3f   :  { %191 = vmatprep.subr.bf16.mxu0 %v539_v13 }
  0x41   :  { %499 = vmatpush3.bf16.msra.mxu1 %v555_v27 }
  0x42   :  { %192 = vmatpush1.bf16.msra.mxu0 %v541_v14  ;;  %500 = vmatprep.subr.bf16.mxu1 %v556_v28 }
  0x43   :  { %193 = vmatprep.subr.bf16.mxu0 %v542_v15 }
  0x45   :  { %501 = vmatpush3.bf16.msra.mxu1 %v557_v29 }
  0x46   :  { %194 = vmatpush1.bf16.msra.mxu0 %v544_v16  ;;  %502 = vmatprep.subr.bf16.mxu1 %v558_v30 }
  0x49   :  { %212 = vmatmul.mubr.bf16.vlgmr.msra.gmra.mxu0 %v545_v17  ;;  %503 = vmatpush3.bf16.msra.mxu1 %v559_v31 }
  0x4a   :  { %504 = vmatprep.subr.bf16.mxu1 %v560_v32 }
  0x4d   :  { %505 = vmatpush3.bf16.msra.mxu1 %v561_v33 }
 0x109   :  { %v213_v41 = vpop.f32.mrf.mxu0 }
 0x10a   :  { %v214_v42 = vadd.f32 %v213_v41, %v86_v39 }
 0x10b   :  { %v215_v43 = vpop.f32.mrf.mxu0 }
 0x10c   :  { %v226_v44 = vmul.f32 0.044715, %v214_v42  ;;  %v216_v45 = vadd.f32 %v215_v43, %v90_v40  ;;  %v222_v16 = vmul.f32 0.5, %v214_v42 }
 0x10d   :  { %v217_v46 = vpop.f32.mrf.mxu0 }
 0x10e   :  { %v230_v47 = vmul.f32 %v226_v44, %v214_v42  ;;  %v227_v48 = vmul.f32 0.044715, %v216_v45  ;;  %v218_v49 = vadd.f32 %v217_v46, %v86_v39  ;;  %v223_v13 = vmul.f32 0.5, %v216_v45 }
 0x10f   :  { %v219_v50 = vpop.f32.mrf.mxu0 }
 0x110   :  { %v234_v51 = vmul.f32 %v230_v47, %v214_v42  ;;  %v228_v52 = vmul.f32 0.044715, %v218_v49  ;;  %v220_v53 = vadd.f32 %v219_v50, %v90_v40  ;;  %v231_v54 = vmul.f32 %v227_v48, %v216_v45 }
 0x111   :  { %v224_v11 = vmul.f32 0.5, %v218_v49 }
 0x112   :  { %v232_v55 = vmul.f32 %v228_v52, %v218_v49  ;;  %v229_v56 = vmul.f32 0.044715, %v220_v53  ;;  %v235_v57 = vmul.f32 %v231_v54, %v216_v45  ;;  %v238_v58 = vadd.f32 %v234_v51, %v214_v42 }
 0x113   :  { %v225_v14 = vmul.f32 0.5, %v220_v53 }
 0x114   :  { %v236_v59 = vmul.f32 %v232_v55, %v218_v49  ;;  %v233_v60 = vmul.f32 %v229_v56, %v220_v53  ;;  %v239_v61 = vadd.f32 %v235_v57, %v216_v45  ;;  %v242_v62 = vmul.f32 0.7978846, %v238_v58 }
 0x116   :  { %v237_v63 = vmul.f32 %v233_v60, %v220_v53  ;;  %v243_v0 = vmul.f32 0.7978846, %v239_v61  ;;  %v240_v1 = vadd.f32 %v236_v59, %v218_v49 }
 0x118   :  { %v241_v2 = vadd.f32 %v237_v63, %v220_v53  ;;  %562 = vtanh.f32 %v243_v0  ;;  %v244_v3 = vmul.f32 0.7978846, %v240_v1 }
 0x119   :  { %564 = vtanh.f32 %v242_v62 }
 0x11a   :  { %v245_v4 = vmul.f32 0.7978846, %v241_v2  ;;  %566 = vtanh.f32 %v244_v3 }
 0x11c   :  { %568 = vtanh.f32 %v245_v4 }
 0x125   :  { %v563_v5 = vpop.eup %562 }
 0x126   :  { %v565_v6 = vpop.eup %564  ;;  %v251_v8 = vadd.f32 1.0, %v563_v5 }
 0x127   :  { %v567_v7 = vpop.eup %566  ;;  %v250_v12 = vadd.f32 1.0, %v565_v6 }
 0x128   :  { %v252_v9 = vadd.f32 1.0, %v567_v7  ;;  %v255_v18 = vmul.f32 %v251_v8, %v223_v13 }
 0x129   :  { %v569_v10 = vpop.eup %568  ;;  %v254_v20 = vmul.f32 %v250_v12, %v222_v16 }
 0x12a   :  { %v253_v15 = vadd.f32 1.0, %v569_v10  ;;  %v256_v17 = vmul.f32 %v252_v9, %v224_v11 }
 0x12c   :  { %v257_v19 = vmul.f32 %v253_v15, %v225_v14  ;;  %v258_v22 = vpack.c.bf16 %v256_v17, %v254_v20 }
 0x12e   :  { %v259_v21 = vpack.c.bf16 %v257_v19, %v255_v18 }
 0x130   :  { %427 = vmatprep.mubr.bf16.mxu1 %v259_v21 }
 0x131   :  { %428 = vmatmul.mubr.bf16.vlgmr.msra.gmra.mxu1 %v258_v22 }
 0x1f1   :  { %v506_v23 = vpop.f32.mrf.mxu1 }
 0x1f3   :  { %v507_v25 = vpop.f32.mrf.mxu1 }
 0x1f4   :  { %v508_v26 = vadd.f32 %v507_v25, %v506_v23 }
 0x1f5   :  { %v509_v27 = vpop.f32.mrf.mxu1 }
 0x1f6   :  { %v430_v28 = vadd.f32 %v508_v26, %v473_v24 }
 0x1f7   :  { %v510_v29 = vpop.f32.mrf.mxu1 }
 0x1f8   :  { %436 = vst [vmem:[#allocation8] sm:$0xff] %v430_v28  ;;  %v511_v30 = vadd.f32 %v510_v29, %v509_v27 }
 0x1fa   :  { %v433_v31 = vadd.f32 %v511_v30, %v473_v24 }
 0x1fc   :  { %437 = vst [vmem:[#allocation8 + $0x8] sm:$0xff] %v433_v31 }
 0x1fd   :  { %641 = shalt.err (!%p638_p5)
}
 0x1fe   :  { %449 = dma.vmem_to_hbm [thread:$0]  %s444_s13, 256, %s724_s5, [#allocation4], %s657_s21, %s657_s21, %s658_s22  }
 0x1ff   :  { %654 = dma.done.wait [#allocation4], 256  }
 0x200   :  { %655 = vsyncadd [#allocation4], 4294967040 }
 0x201   :  { %453 = vsyncpa [#allocation3], 1 }
 0x202   :  { %454 = vsyncpa [#allocation6], 1 }
 0x203   :  { %455 = vsyncpa [#allocation4], 1 }

</bundles_post_ra>
